<compile_context>
chip_gen: v7x
topology: tpu7x:2x2x1
jax: 0.10.0
libtpu: 0.0.40
codegen_flags: <defaults>
</compile_context>

<pallas_src>
import functools

import numpy as np
import jax
import jax.numpy as jnp
from jax import lax
from jax.scipy.special import logsumexp
from jax.experimental import pallas as pl
from jax.experimental.pallas import tpu as pltpu


# ---------------------------------------------------------------------------
# CTC_CRF structure (matches bonito.crf.model.CTC_CRF.__init__)
# ---------------------------------------------------------------------------
def ctc_crf_idx(n_base, state_len):
    n_states = n_base ** state_len
    states = np.arange(n_states)
    col0 = states[:, None]                                   # stay / blank
    rest = np.repeat(states, n_base).reshape(n_base, -1).T   # base transitions
    return np.concatenate([col0, rest], axis=1).astype(np.int32)  # (n_states, NZ)


def build_matrices(idx, n_states, nz):
    """One-hot matrices turning the sparse gather / grouped sum into matmuls.

    Entries are 0/1, so bf16 storage is exact and halves HBM/VMEM footprint
    (matters at production CRF sizes: state_len=5 -> S=1024, C=5120).
    """
    C = n_states * nz
    gather_T = np.zeros((n_states, C), np.float32)  # column s*nz+j selects alpha[idx[s,j]]
    group = np.zeros((C, n_states), np.float32)     # sums each contiguous group of nz lanes
    for s in range(n_states):
        for j in range(nz):
            gather_T[idx[s, j], s * nz + j] = 1.0
            group[s * nz + j, s] = 1.0
    return jnp.asarray(gather_T, jnp.bfloat16), jnp.asarray(group, jnp.bfloat16)


# ---------------------------------------------------------------------------
# Tiling helpers
# ---------------------------------------------------------------------------
def _largest_divisor_leq(n, cap):
    cap = max(1, min(n, int(cap)))
    for d in range(cap, 0, -1):
        if n % d == 0:
            return d
    return 1


def _padded_bytes(shape, itemsize):
    dims = list(shape)
    dims[-1] = -(-dims[-1] // 128) * 128
    if len(dims) >= 2:
        dims[-2] = -(-dims[-2] // 8) * 8
    n = 1
    for d in dims:
        n *= int(d)
    return n * itemsize


def _vmem_limit(byte_estimate):
    # Explicit scoped-VMEM request with headroom, capped under v7x's 64 MiB/core.
    return int(min(64 * 2**20, max(16 * 2**20, 2 * byte_estimate)))


# ---------------------------------------------------------------------------
# Kernel 1: CRF forward recursion (logZ).
# Grid = (batch blocks [parallel], time blocks [arbitrary]); alpha lives in a
# VMEM scratch that persists across the (inner) time axis.
# ---------------------------------------------------------------------------
def _logz_kernel(x_ref, gT_ref, grp_ref, logz_ref, alpha_ref, *, t_block, unroll):
    t_blk = pl.program_id(1)

    @pl.when(t_blk == 0)
    def _():
        alpha_ref[...] = jnp.zeros_like(alpha_ref)      # Log-semiring "one" == 0.0

    # Hoisted out of the per-timestep loop: upcast the 0/1 selection matrix once
    # per grid step.  The gather matmul stays f32 so alpha keeps full precision
    # (alpha grows ~linearly with T; bf16 alpha would be badly lossy at T~2000).
    gT = gT_ref[...].astype(jnp.float32)                # (S, C)
    grp = grp_ref[...]                                  # (C, S) bf16 0/1

    def step(i, alpha):
        x = x_ref[i].astype(jnp.float32)                # (Nb, C), cast in-register
        # gathered[n, s*NZ + j] = alpha[n, idx[s, j]]   (selection as matmul)
        gathered = jnp.dot(alpha, gT, preferred_element_type=jnp.float32)
        s = x + gathered                                # (Nb, C)
        m = jnp.max(s, axis=-1, keepdims=True)          # (Nb, 1) row max
        # Clamp so exp() never underflows to exactly 0 for an entire group:
        # alpha therefore never reaches -inf and the gather matmul can't make
        # NaNs via -inf * 0.  (A fully structured per-group max via a channel-
        # permuted (NZ, S) layout is the production alternative; the clamped
        # row max is kept here for lowering robustness.)
        e = jnp.exp(jnp.maximum(s - m, -80.0))          # (Nb, C), values in (0, 1]
        # Grouped sum over each contiguous block of NZ channels on the bf16 MXU
        # path with f32 accumulation (e and grp are bf16-exact enough: e<=1, grp 0/1).
        gs = jnp.dot(e.astype(jnp.bfloat16), grp, preferred_element_type=jnp.float32)
        return m + jnp.log(gs)                          # (Nb, S)

    alpha = lax.fori_loop(0, t_block, step, alpha_ref[...], unroll=unroll)
    alpha_ref[...] = alpha

    @pl.when(t_blk == pl.num_programs(1) - 1)
    def _():
        am = jnp.max(alpha, axis=-1, keepdims=True)
        logz_ref[...] = am + jnp.log(jnp.sum(jnp.exp(alpha - am), axis=-1, keepdims=True))


# ---------------------------------------------------------------------------
# Kernel 2: out[t, n, c] = float32(x[t, n, c]) - logZ[n] / T, cast back to x.dtype.
# Pure HBM streaming -> large lane-dense (Tt, N, C) tiles, native-dtype in/out.
# ---------------------------------------------------------------------------
def _norm_kernel(x_ref, logz_ref, o_ref, *, inv_t):
    x = x_ref[...].astype(jnp.float32)      # (Tt, N, C)
    z = logz_ref[...] * inv_t               # (N, 1)
    o_ref[...] = (x - z[None, :, :]).astype(o_ref.dtype)


# ---------------------------------------------------------------------------
# Wrapper
# ---------------------------------------------------------------------------
def global_norm(x, gather_T, group, *, t_block_logz=None, t_block_norm=None, n_block=None):
    """(scores - logZ(scores)[:, None] / T).astype(x.dtype) with scores = x.float()."""
    T, N, C = x.shape
    S = gather_T.shape[0]
    itemsize = x.dtype.itemsize

    # ---- tile-size selection ------------------------------------------------
    if n_block is None:
        # Two batch blocks when cleanly possible so v7x's two TensorCores can
        # each take half the batch (batch grid axis is "parallel").
        n_block = N // 2 if (N % 32 == 0) else N
    assert N % n_block == 0

    if t_block_logz is None:
        # ~2 MiB of x per buffer (double-buffered by the pipeline).
        t_block_logz = _largest_divisor_leq(T, (2 * 2**20) // max(1, n_block * C * itemsize))
    assert T % t_block_logz == 0

    if t_block_norm is None:
        # Kernel 2 is HBM-bound: use big tiles (~4 MiB per buffer).
        t_block_norm = _largest_divisor_leq(T, (4 * 2**20) // max(1, N * C * itemsize))
    assert T % t_block_norm == 0

    # ---- kernel 1: logZ -------------------------------------------------------
    logz_vmem = (2 * _padded_bytes((t_block_logz, n_block, C), itemsize)
                 + 2 * _padded_bytes((S, C), 2)
                 + 2 * _padded_bytes((C, S), 2)
                 + _padded_bytes((n_block, S), 4)
                 + 2 * _padded_bytes((n_block, 1), 4))

    logz = pl.pallas_call(
        functools.partial(_logz_kernel, t_block=t_block_logz,
                          unroll=True if t_block_logz <= 8 else 8),
        out_shape=jax.ShapeDtypeStruct((N, 1), jnp.float32),
        grid_spec=pltpu.PrefetchScalarGridSpec(
            num_scalar_prefetch=0,
            grid=(N // n_block, T // t_block_logz),      # (batch blocks, time blocks)
            in_specs=[
                pl.BlockSpec((t_block_logz, n_block, C), lambda b, t: (t, b, 0)),
                pl.BlockSpec((S, C), lambda b, t: (0, 0)),
                pl.BlockSpec((C, S), lambda b, t: (0, 0)),
            ],
            out_specs=pl.BlockSpec((n_block, 1), lambda b, t: (b, 0)),
            scratch_shapes=[pltpu.VMEM((n_block, S), jnp.float32)],
        ),
        compiler_params=pltpu.CompilerParams(
            dimension_semantics=("parallel", "arbitrary"),
            vmem_limit_bytes=_vmem_limit(logz_vmem),
        ),
    )(x, gather_T, group)

    # ---- kernel 2: out = scores - logZ / T ------------------------------------
    norm_vmem = (4 * _padded_bytes((t_block_norm, N, C), itemsize)
                 + 2 * _padded_bytes((N, 1), 4))

    out = pl.pallas_call(
        functools.partial(_norm_kernel, inv_t=1.0 / T),
        out_shape=jax.ShapeDtypeStruct((T, N, C), x.dtype),
        grid_spec=pltpu.PrefetchScalarGridSpec(
            num_scalar_prefetch=0,
            grid=(T // t_block_norm,),
            in_specs=[
                pl.BlockSpec((t_block_norm, N, C), lambda t: (t, 0, 0)),
                pl.BlockSpec((N, 1), lambda t: (0, 0)),
            ],
            out_specs=pl.BlockSpec((t_block_norm, N, C), lambda t: (t, 0, 0)),
        ),
        compiler_params=pltpu.CompilerParams(
            dimension_semantics=("parallel",),
            vmem_limit_bytes=_vmem_limit(norm_vmem),
        ),
    )(x, logz)
    return out


# ---------------------------------------------------------------------------
# Pure-JAX reference (mirrors seqdist.sparse.logZ with Log semiring)
# ---------------------------------------------------------------------------
def global_norm_ref(x, idx, n_states, nz):
    scores = x.astype(jnp.float32)
    T, N, C = scores.shape
    Ms = scores.reshape(T, N, n_states, nz)
    alpha0 = jnp.zeros((N, n_states), jnp.float32)

    def step(alpha, M):
        g = alpha[:, idx]                      # (N, n_states, nz) gathered predecessors
        return logsumexp(M + g, axis=-1), None

    alpha, _ = jax.lax.scan(step, alpha0, Ms)
    logz = logsumexp(alpha, axis=-1)           # (N,)
    return (scores - logz[:, None] / T).astype(x.dtype)


if __name__ == "__main__":
    # CTC_CRF config: alphabet "NACGT" -> n_base=4, state_len=2 -> 16 states, NZ=5, C=80
    n_base, state_len = 4, 2
    n_states = n_base ** state_len
    nz = n_base + 1
    C = n_states * nz
    T, N = 16, 16

    idx_np = ctc_crf_idx(n_base, state_len)
    gather_T, group = build_matrices(idx_np, n_states, nz)
    idx = jnp.asarray(idx_np)

    key = jax.random.PRNGKey(0)
    x_f32 = jax.random.normal(key, (T, N, C), dtype=jnp.float32)

    # --- f32 input; exercise batch blocking (grid (2,4)) and time blocking ----
    out = jax.block_until_ready(
        global_norm(x_f32, gather_T, group, t_block_logz=4, t_block_norm=8, n_block=8))
    ref = jax.block_until_ready(global_norm_ref(x_f32, idx, n_states, nz))
    # atol budget dominated by the deliberate bf16 group-sum matmul (~1e-3 in logZ/T)
    np.testing.assert_allclose(np.asarray(out), np.asarray(ref), rtol=1e-3, atol=5e-3)

    # --- bf16 input (bonito production dtype): no f32 copy of x is made -------
    x_bf16 = x_f32.astype(jnp.bfloat16)
    out_bf = jax.block_until_ready(global_norm(x_bf16, gather_T, group, t_block_logz=4))
    ref_bf = jax.block_until_ready(global_norm_ref(x_bf16, idx, n_states, nz))
    assert out_bf.dtype == jnp.bfloat16
    # tolerance covers bf16 output quantization (one ulp) + bf16 group-sum matmul
    np.testing.assert_allclose(np.asarray(out_bf.astype(jnp.float32)),
                               np.asarray(ref_bf.astype(jnp.float32)),
                               rtol=1e-2, atol=1e-2)

    print("KERNEL_OK")
</pallas_src>

<mosaic_0001>
module attributes {stable_mosaic.version = 11 : i64} {
  func.func @_logz_kernel(%arg0: i32, %arg1: i32, %arg2: memref<4x8x80xf32, #tpu.memory_space<vmem>>, %arg3: memref<16x80xbf16, #tpu.memory_space<vmem>>, %arg4: memref<80x16xbf16, #tpu.memory_space<vmem>>, %arg5: memref<8x1xf32, #tpu.memory_space<vmem>>, %arg6: memref<8x16xf32, #tpu.memory_space<vmem>>) attributes {dimension_semantics = [#tpu.dimension_semantics<parallel>, #tpu.dimension_semantics<arbitrary>], iteration_bounds = array<i64: 2, 4>, scalar_prefetch = 0 : i64, scratch_operands = 1 : i64, tpu.core_type = #tpu.core_type<tc>, window_params = [{transform_indices = @transform_0, window_bounds = array<i64: 4, 8, 80>}, {pipeline_mode = #tpu.pipeline_mode<synchronous>, transform_indices = @transform_1, window_bounds = array<i64: 16, 80>}, {pipeline_mode = #tpu.pipeline_mode<synchronous>, transform_indices = @transform_2, window_bounds = array<i64: 80, 16>}, {transform_indices = @transform_3, window_bounds = array<i64: 8, 1>}]} {
    %c0_i32 = arith.constant 0 : i32
    %0 = arith.cmpi eq, %arg1, %c0_i32 : i32
    %1 = arith.extui %0 : i1 to i32
    %c0_i32_0 = arith.constant 0 : i32
    %2 = arith.cmpi ne, %1, %c0_i32_0 : i32
    scf.if %2 {
      %cst_34 = arith.constant 0.000000e+00 : f32
      %79 = vector.broadcast %cst_34 : f32 to vector<8x16xf32>
      %c0_35 = arith.constant 0 : index
      %c0_36 = arith.constant 0 : index
      %80 = vector.load %arg6[%c0_35, %c0_36] : memref<8x16xf32, #tpu.memory_space<vmem>>, vector<8x16xf32>
      tpu.vector_store %arg6[%c0_35, %c0_36], %79 {strides = array<i32>} : memref<8x16xf32, #tpu.memory_space<vmem>>, vector<8x16xf32>,
    } else {
    }
    %c0 = arith.constant 0 : index
    %c0_1 = arith.constant 0 : index
    %3 = vector.load %arg3[%c0, %c0_1] : memref<16x80xbf16, #tpu.memory_space<vmem>>, vector<16x80xbf16>
    %4 = arith.extf %3 : vector<16x80xbf16> to vector<16x80xf32>
    %c0_2 = arith.constant 0 : index
    %c0_3 = arith.constant 0 : index
    %5 = vector.load %arg4[%c0_2, %c0_3] : memref<80x16xbf16, #tpu.memory_space<vmem>>, vector<80x16xbf16>
    %c0_4 = arith.constant 0 : index
    %c0_5 = arith.constant 0 : index
    %6 = vector.load %arg6[%c0_4, %c0_5] : memref<8x16xf32, #tpu.memory_space<vmem>>, vector<8x16xf32>
    %c0_i32_6 = arith.constant 0 : i32
    %7 = arith.index_cast %c0_i32_6 : i32 to index
    %c0_7 = arith.constant 0 : index
    %c0_8 = arith.constant 0 : index
    %8 = vector.load %arg2[%7, %c0_7, %c0_8] : memref<4x8x80xf32, #tpu.memory_space<vmem>>, vector<1x8x80xf32>
    %9 = vector.shape_cast %8 : vector<1x8x80xf32> to vector<8x80xf32>
    %cst = arith.constant dense<0.000000e+00> : vector<8x80xf32>
    %10 = tpu.matmul %6, %4, %cst {dimension_numbers = #tpu.dot_dimension_numbers<[1], [0], [0], [1], [0, 0, 1, 1], [], []>} : vector<8x16xf32>, vector<16x80xf32>, vector<8x80xf32> -> vector<8x80xf32>
    %11 = arith.addf %9, %10 : vector<8x80xf32>
    %cst_9 = arith.constant dense<0xFF800000> : vector<8xf32>
    %12 = vector.multi_reduction <maximumf>, %11, %cst_9 [1] : vector<8x80xf32> to vector<8xf32>
    %13 = vector.shape_cast %12 : vector<8xf32> to vector<8x1xf32>
    %14 = vector.broadcast %13 : vector<8x1xf32> to vector<8x80xf32>
    %15 = arith.subf %11, %14 : vector<8x80xf32>
    %cst_10 = arith.constant -8.000000e+01 : f32
    %16 = vector.broadcast %cst_10 : f32 to vector<8x80xf32>
    %17 = arith.maximumf %15, %16 : vector<8x80xf32>
    %18 = math.exp %17 : vector<8x80xf32>
    %19 = arith.truncf %18 : vector<8x80xf32> to vector<8x80xbf16>
    %cst_11 = arith.constant dense<0.000000e+00> : vector<8x16xf32>
    %20 = tpu.matmul %19, %5, %cst_11 {dimension_numbers = #tpu.dot_dimension_numbers<[1], [0], [0], [1], [0, 0, 1, 1], [], []>} : vector<8x80xbf16>, vector<80x16xbf16>, vector<8x16xf32> -> vector<8x16xf32>
    %21 = math.log %20 : vector<8x16xf32>
    %22 = vector.broadcast %13 : vector<8x1xf32> to vector<8x16xf32>
    %23 = arith.addf %22, %21 : vector<8x16xf32>
    %c1_i32 = arith.constant 1 : i32
    %24 = arith.index_cast %c1_i32 : i32 to index
    %c0_12 = arith.constant 0 : index
    %c0_13 = arith.constant 0 : index
    %25 = vector.load %arg2[%24, %c0_12, %c0_13] : memref<4x8x80xf32, #tpu.memory_space<vmem>>, vector<1x8x80xf32>
    %26 = vector.shape_cast %25 : vector<1x8x80xf32> to vector<8x80xf32>
    %cst_14 = arith.constant dense<0.000000e+00> : vector<8x80xf32>
    %27 = tpu.matmul %23, %4, %cst_14 {dimension_numbers = #tpu.dot_dimension_numbers<[1], [0], [0], [1], [0, 0, 1, 1], [], []>} : vector<8x16xf32>, vector<16x80xf32>, vector<8x80xf32> -> vector<8x80xf32>
    %28 = arith.addf %26, %27 : vector<8x80xf32>
    %cst_15 = arith.constant dense<0xFF800000> : vector<8xf32>
    %29 = vector.multi_reduction <maximumf>, %28, %cst_15 [1] : vector<8x80xf32> to vector<8xf32>
    %30 = vector.shape_cast %29 : vector<8xf32> to vector<8x1xf32>
    %31 = vector.broadcast %30 : vector<8x1xf32> to vector<8x80xf32>
    %32 = arith.subf %28, %31 : vector<8x80xf32>
    %cst_16 = arith.constant -8.000000e+01 : f32
    %33 = vector.broadcast %cst_16 : f32 to vector<8x80xf32>
    %34 = arith.maximumf %32, %33 : vector<8x80xf32>
    %35 = math.exp %34 : vector<8x80xf32>
    %36 = arith.truncf %35 : vector<8x80xf32> to vector<8x80xbf16>
    %cst_17 = arith.constant dense<0.000000e+00> : vector<8x16xf32>
    %37 = tpu.matmul %36, %5, %cst_17 {dimension_numbers = #tpu.dot_dimension_numbers<[1], [0], [0], [1], [0, 0, 1, 1], [], []>} : vector<8x80xbf16>, vector<80x16xbf16>, vector<8x16xf32> -> vector<8x16xf32>
    %38 = math.log %37 : vector<8x16xf32>
    %39 = vector.broadcast %30 : vector<8x1xf32> to vector<8x16xf32>
    %40 = arith.addf %39, %38 : vector<8x16xf32>
    %c2_i32 = arith.constant 2 : i32
    %41 = arith.index_cast %c2_i32 : i32 to index
    %c0_18 = arith.constant 0 : index
    %c0_19 = arith.constant 0 : index
    %42 = vector.load %arg2[%41, %c0_18, %c0_19] : memref<4x8x80xf32, #tpu.memory_space<vmem>>, vector<1x8x80xf32>
    %43 = vector.shape_cast %42 : vector<1x8x80xf32> to vector<8x80xf32>
    %cst_20 = arith.constant dense<0.000000e+00> : vector<8x80xf32>
    %44 = tpu.matmul %40, %4, %cst_20 {dimension_numbers = #tpu.dot_dimension_numbers<[1], [0], [0], [1], [0, 0, 1, 1], [], []>} : vector<8x16xf32>, vector<16x80xf32>, vector<8x80xf32> -> vector<8x80xf32>
    %45 = arith.addf %43, %44 : vector<8x80xf32>
    %cst_21 = arith.constant dense<0xFF800000> : vector<8xf32>
    %46 = vector.multi_reduction <maximumf>, %45, %cst_21 [1] : vector<8x80xf32> to vector<8xf32>
    %47 = vector.shape_cast %46 : vector<8xf32> to vector<8x1xf32>
    %48 = vector.broadcast %47 : vector<8x1xf32> to vector<8x80xf32>
    %49 = arith.subf %45, %48 : vector<8x80xf32>
    %cst_22 = arith.constant -8.000000e+01 : f32
    %50 = vector.broadcast %cst_22 : f32 to vector<8x80xf32>
    %51 = arith.maximumf %49, %50 : vector<8x80xf32>
    %52 = math.exp %51 : vector<8x80xf32>
    %53 = arith.truncf %52 : vector<8x80xf32> to vector<8x80xbf16>
    %cst_23 = arith.constant dense<0.000000e+00> : vector<8x16xf32>
    %54 = tpu.matmul %53, %5, %cst_23 {dimension_numbers = #tpu.dot_dimension_numbers<[1], [0], [0], [1], [0, 0, 1, 1], [], []>} : vector<8x80xbf16>, vector<80x16xbf16>, vector<8x16xf32> -> vector<8x16xf32>
    %55 = math.log %54 : vector<8x16xf32>
    %56 = vector.broadcast %47 : vector<8x1xf32> to vector<8x16xf32>
    %57 = arith.addf %56, %55 : vector<8x16xf32>
    %c3_i32 = arith.constant 3 : i32
    %58 = arith.index_cast %c3_i32 : i32 to index
    %c0_24 = arith.constant 0 : index
    %c0_25 = arith.constant 0 : index
    %59 = vector.load %arg2[%58, %c0_24, %c0_25] : memref<4x8x80xf32, #tpu.memory_space<vmem>>, vector<1x8x80xf32>
    %60 = vector.shape_cast %59 : vector<1x8x80xf32> to vector<8x80xf32>
    %cst_26 = arith.constant dense<0.000000e+00> : vector<8x80xf32>
    %61 = tpu.matmul %57, %4, %cst_26 {dimension_numbers = #tpu.dot_dimension_numbers<[1], [0], [0], [1], [0, 0, 1, 1], [], []>} : vector<8x16xf32>, vector<16x80xf32>, vector<8x80xf32> -> vector<8x80xf32>
    %62 = arith.addf %60, %61 : vector<8x80xf32>
    %cst_27 = arith.constant dense<0xFF800000> : vector<8xf32>
    %63 = vector.multi_reduction <maximumf>, %62, %cst_27 [1] : vector<8x80xf32> to vector<8xf32>
    %64 = vector.shape_cast %63 : vector<8xf32> to vector<8x1xf32>
    %65 = vector.broadcast %64 : vector<8x1xf32> to vector<8x80xf32>
    %66 = arith.subf %62, %65 : vector<8x80xf32>
    %cst_28 = arith.constant -8.000000e+01 : f32
    %67 = vector.broadcast %cst_28 : f32 to vector<8x80xf32>
    %68 = arith.maximumf %66, %67 : vector<8x80xf32>
    %69 = math.exp %68 : vector<8x80xf32>
    %70 = arith.truncf %69 : vector<8x80xf32> to vector<8x80xbf16>
    %cst_29 = arith.constant dense<0.000000e+00> : vector<8x16xf32>
    %71 = tpu.matmul %70, %5, %cst_29 {dimension_numbers = #tpu.dot_dimension_numbers<[1], [0], [0], [1], [0, 0, 1, 1], [], []>} : vector<8x80xbf16>, vector<80x16xbf16>, vector<8x16xf32> -> vector<8x16xf32>
    %72 = math.log %71 : vector<8x16xf32>
    %73 = vector.broadcast %64 : vector<8x1xf32> to vector<8x16xf32>
    %74 = arith.addf %73, %72 : vector<8x16xf32>
    %c4_i32 = arith.constant 4 : i32
    %c0_30 = arith.constant 0 : index
    %c0_31 = arith.constant 0 : index
    %75 = vector.load %arg6[%c0_30, %c0_31] : memref<8x16xf32, #tpu.memory_space<vmem>>, vector<8x16xf32>
    tpu.vector_store %arg6[%c0_30, %c0_31], %74 {strides = array<i32>} : memref<8x16xf32, #tpu.memory_space<vmem>>, vector<8x16xf32>,
    %c3_i32_32 = arith.constant 3 : i32
    %76 = arith.cmpi eq, %arg1, %c3_i32_32 : i32
    %77 = arith.extui %76 : i1 to i32
    %c0_i32_33 = arith.constant 0 : i32
    %78 = arith.cmpi ne, %77, %c0_i32_33 : i32
    scf.if %78 {
      %cst_34 = arith.constant dense<0xFF800000> : vector<8xf32>
      %79 = vector.multi_reduction <maximumf>, %74, %cst_34 [1] : vector<8x16xf32> to vector<8xf32>
      %80 = vector.shape_cast %79 : vector<8xf32> to vector<8x1xf32>
      %81 = vector.broadcast %80 : vector<8x1xf32> to vector<8x16xf32>
      %82 = arith.subf %74, %81 : vector<8x16xf32>
      %83 = math.exp %82 : vector<8x16xf32>
      %cst_35 = arith.constant dense<0.000000e+00> : vector<8xf32>
      %84 = vector.multi_reduction <add>, %83, %cst_35 [1] : vector<8x16xf32> to vector<8xf32>
      %85 = vector.shape_cast %84 : vector<8xf32> to vector<8x1xf32>
      %86 = math.log %85 : vector<8x1xf32>
      %87 = arith.addf %80, %86 : vector<8x1xf32>
      %c0_36 = arith.constant 0 : index
      %c0_37 = arith.constant 0 : index
      %88 = vector.load %arg5[%c0_36, %c0_37] : memref<8x1xf32, #tpu.memory_space<vmem>>, vector<8x1xf32>
      tpu.vector_store %arg5[%c0_36, %c0_37], %87 {strides = array<i32>} : memref<8x1xf32, #tpu.memory_space<vmem>>, vector<8x1xf32>,
    } else {
    }
    return
  }
  func.func @transform_0(%arg0: i32, %arg1: i32) -> (i32, i32, i32) {
    %c0_i32 = arith.constant 0 : i32
    %c0_i32_0 = arith.constant 0 : i32
    return %arg1, %arg0, %c0_i32 : i32, i32, i32
  }
  func.func @transform_1(%arg0: i32, %arg1: i32) -> (i32, i32) {
    %c0_i32 = arith.constant 0 : i32
    %c0_i32_0 = arith.constant 0 : i32
    %c0_i32_1 = arith.constant 0 : i32
    return %c0_i32, %c0_i32_0 : i32, i32
  }
  func.func @transform_2(%arg0: i32, %arg1: i32) -> (i32, i32) {
    %c0_i32 = arith.constant 0 : i32
    %c0_i32_0 = arith.constant 0 : i32
    %c0_i32_1 = arith.constant 0 : i32
    return %c0_i32, %c0_i32_0 : i32, i32
  }
  func.func @transform_3(%arg0: i32, %arg1: i32) -> (i32, i32) {
    %c0_i32 = arith.constant 0 : i32
    %c0_i32_0 = arith.constant 0 : i32
    return %arg0, %c0_i32 : i32, i32
  }
}

</mosaic_0001>

<bundles_post_ra>
// kernel: tpu_custom_call.1
= control target key start
LH: loop header
LB: loop body
LE: loop exit
PB: predicated region body
PF: predicated region fallthrough
CT: control target
= control target key end

     0   :  { %8 = vsyncpa [#allocation4], 0  ;;  %s1540_s0 = inlined_call_operand.hbm [shape: f32[16,16,80], index: 0, kind: input, shape index: {}]   ;;  %s1541_s1 = inlined_call_operand.vmem [shape: bf16[16,80], index: 1, kind: input, shape index: {}]   ;;  %s1542_s2 = inlined_call_operand.vmem [shape: bf16[80,16], index: 2, kind: input, shape index: {}]   ;;  %s1543_s3 = inlined_call_operand.vmem [shape: f32[16,1], index: 3, kind: output, shape index: {}]  }
   0x1   :  { %10 = vsyncpa [#allocation4 + $0x1], 0  ;;  %s1273_s12 = smov 0   ;;  %s1275_s13 = smov 0  }
   0x2   :  { %s1277_s14 = smov 0   ;;  %s1279_s15 = smov 0  }
   0x3   :  { %s1281_s16 = smov 0   ;;  %s1283_s17 = smov 0  }
   0x4   :  { %s1285_s18 = smov 0   ;;  %s1287_s19 = smov 0  }
   0x5 LB: > { %s876_s20 = sadd.s32 4294967295, %s1243_s19   ;;  %s25_s21 = sadd.s32 1, %s1235_s17  ;;  %s1243_s19 = sphi %s1287_s19, %s16_s19   ;;  %s1239_s18 = sphi %s1285_s18, %s1554_s18   ;;  %s1235_s17 = sphi %s1283_s17, %s1553_s17   ;;  %s1231_s16 = sphi %s1281_s16, %s1552_s16   ;;  %s1227_s15 = sphi %s1279_s15, %s1551_s15   ;;  %s1223_s14 = sphi %s1277_s14, %s1550_s14   ;;  %s1219_s13 = sphi %s1275_s13, %s1549_s13   ;;  %s1215_s12 = sphi %s1273_s12, %s1548_s12  }
   0x6   : > { %p26_p0 = scmp.ge.s32.totalorder %s25_s21, 4  ;;  %s28_s22 = sadd.s32 1, %s1239_s18 }
   0x7   : > { %s37_s23 = sadd.s32 1, %s1223_s14  ;;  %p44_p1 = scmp.ne.s32.totalorder %s1223_s14, %s1219_s13 }
   0x8   : > { %s1556_s21 = smov (%p26_p0, %s25_s21), 0  ;;  %s1558_s22 = smov (!%p26_p0, %s28_s22), %s1239_s18 }
   0x9   : > { %s32_s24 = ssub.s32 %s1235_s17, %s1556_s21  ;;  %p45_p2 = scmp.eq.s32.totalorder %s1243_s19, 0 }
   0xa   : > { %p30_p3 = scmp.ge.s32.totalorder %s1558_s22, 2  ;;  %p50_p4 = scmp.ne.s32.totalorder %s1219_s13, %s1215_s12 }
   0xb   : > { %p1324_p5 = por %p45_p2, %p44_p1  ;;  %p51_p6 = scmp.eq.s32.totalorder %s876_s20, 0 }
   0xc   : > { %s1560_s22 = smov (%p30_p3, %s1558_s22), 0  ;;  %p1050_p8 = scmp.lt.s32.totalorder %s1243_s19, 8 }
   0xd   : > { %p1330_p7 = por %p51_p6, %p50_p4  ;;  %s33_s27 = ssub.s32 %s1239_s18, %s1560_s22 }
   0xe   : > { %s34_s28 = sor.u32 %s33_s27, %s32_s24  ;;  %s148_s29 = sand.u32 1, %s1223_s14  }
   0xf   : > { %p35_p9 = scmp.eq.s32.totalorder %s34_s28, 0  ;;  %s880_s30 = sshll.u32 %s148_s29, 5 }
  0x10   : > { %s907_s4 = sshll.u32 %s1235_s17, 3  ;;  %s152_s8 = scalar_lea.vmem [#allocation3], %s880_s30 }
  0x11   : > { %s1340_s5 = scalar_select %p35_p9, %s1223_s14, %s37_s23  }
  0x12   : > { %s158_s6 = sadd.s32 %s1239_s18, %s907_s4  ;;  %s161_s9 = sshll.u32 %s152_s8, 4  ;;  %s1348_s9 = int_to_ptr.vmem [resolvable:$true] %s161_s9 }
  0x13   : > { %s883_s7 = sshll.u32 %s158_s6, 7  ;;  %p1354_p10 = pnand %p1050_p8, %p1324_p5 }
  0x14   : > { %s1346_s12 = scalar_lea.hbm %s1540_s0, %s883_s7  ;;  %s1359_s23 = scalar_lea.sflag [#allocation4], %s148_s29 }
  0x15   : > { %s1147_s24 = scalar_lea.hbm %s1346_s12, 512  ;;  %p1149_p13 = pneg %p1354_p10 }
  0x16   : > { %p1148_p12 = scmp.ne.s32.totalorder %s1346_s12, %s1147_s24  ;;  %s1152_s28 = scalar_lea.hbm %s1540_s0, 4096 }
  0x17   : > { %p1153_p2 = scmp.lt.u32.totalorder %s1346_s12, %s1540_s0  ;;  %p1154_p3 = scmp.lt.u32.totalorder %s1152_s28, %s1147_s24 }
  0x18   : > { %p1150_p0 = pnand %p1149_p13, %p1148_p12  ;;  %p1156_p5 = scmp.lt.u32.totalorder %s1147_s24, %s1346_s12 }
  0x19   : > { %p1155_p4 = por %p1154_p3, %p1153_p2 }
  0x1a   : > { %p1151_p1 = pneg %p1150_p0 }
  0x1b   : > { %p1157_p6 = por %p1156_p5, %p1155_p4 }
  0x1d   : > { %p1158_p8 = pnand %p1157_p6, %p1151_p1 }
  0x1f   : > { %1161 = shalt.err (!%p1158_p8)
}
  0x20   : > { %s1162_s29 = scalar_lea.vmem %s1348_s9, 512  ;;  %s1245_s6 = smov [#allocation3]  }
  0x21   : > { %p1163_p9 = scmp.ne.s32.totalorder %s1348_s9, %s1162_s29  ;;  %s1167_s7 = sshll.u32 %s1245_s6, 4  ;;  %s1168_s7 = int_to_ptr.vmem [resolvable:$false] %s1167_s7 }
  0x22   : > { %s1169_s8 = scalar_lea.vmem %s1168_s7, 1024  ;;  %p1170_p11 = scmp.lt.s32.totalorder %s1348_s9, %s1168_s7 }
  0x23   : > { %p1165_p12 = pnand %p1163_p9, %p1149_p13  ;;  %p1171_p2 = scmp.lt.s32.totalorder %s1169_s8, %s1162_s29 }
  0x25   : > { %p1166_p0 = pneg %p1165_p12  ;;  %p1172_p3 = por %p1171_p2, %p1170_p11 }
  0x27   : > { %p1173_p4 = pnand %p1172_p3, %p1166_p0 }
  0x29   : > { %1176 = shalt.err (!%p1173_p4)
}
  0x2a   : > { %s1246_s10 = smov 256   ;;  %s1247_s11 = smov 128  }
  0x2b   : > { %s1248_s24 = smov 8   ;;  %p169_p13 = scmp.lt.s32.totalorder %s1243_s19, 9 }
  0x2c   : > { %1049 = dma.hbm_to_vmem [thread:$0]  (!%p1354_p10), %s1346_s12, 512, %s1348_s9, %s1359_s23, %s1246_s10, %s1247_s11, %s1248_s24  }
  0x2d   : > { %p1547_p1 = scmp.ge.s32.totalorder %s1243_s19, 1 }
  0x2f   : > { %p170_p5 = pnand %p1547_p1, %p169_p13 }
  0x30   : > { %s175_s27 = sand.u32 (!%p170_p5), 1, %s1219_s13  }
  0x31   : > { %173 = sbr.rel (%p170_p5) target bundleno = 2800 (0xaf0), region = 32  ;;  %s885_s25 = sshll.u32 (!%p170_p5), %s175_s27, 5 }
  0x32   : > { %s176_s28 = scalar_lea.sflag (!%p170_p5), [#allocation4], %s175_s27  ;;  %s1391_s30 = scalar_lea.vmem (!%p170_p5), [#allocation3], %s885_s25 }
  0x38   : > { %1210 = dma.done.wait (%p1330_p7), %s176_s28, 512  }
  0x39   : > { %1212 = vsyncadd (%p1330_p7), %s176_s28, 4294966784  ;;  %p202_p11 = scmp.lt.s32.totalorder %s1231_s16, 1  ;;  %p887_p10 = scmp.ne.s32.totalorder %s1227_s15, 0 }
  0x3a   : > { %vm211_vm0 = vcmask (!%p887_p10), 130048   ;;  %v1249_v0 = vmov (!%p887_p10), 0.0  }
  0x3b   : > { %s1562_s16 = smov (!%p202_p11, %s1231_s16), 1  ;;  %210 = sbr.rel (%p887_p10) target bundleno = 66 (0x42), region = 40 }
  0x3c   : > { %s886_s9 = sshll.u32 %s1562_s16, 3  ;;  %212 = vst.msk [vmem:[#allocation2] sm:$0xff] (!%p887_p10), %vm211_vm0, %v1249_v0 }
  0x3d   : > { %s1402_s23 = scalar_lea.vmem %s1543_s3, %s886_s9 }
  0x42 PF: > { %v1408_v1 = vld [vmem:[%s1541_s1] sm:$0xff]   ;;  %v1250_v2 = vmov 0.0|0.0   ;;  %vm1251_vm1 = vmmov 0   ;;  %v1252_v3 = vmov 0.0   ;;  %vm229_vm2 = vcmask 130048   ;;  %v228_v5 = vld [vmem:[%s1391_s30] sm:$0xff] }
  0x43   : > { %1032 = vmatprep.subr.bf16.mxu0 %v1250_v2  ;;  %952 = vmatprep.mubr.msk.f32.mxu0 %vm1251_vm1, %v1252_v3  ;;  %v227_v4 = vld [vmem:[#allocation2] sm:$0xff]  ;;  %vm304_vm3 = vcmask 654336   ;;  %v1433_v11 = vld [vmem:[%s1542_s2 + $0x8] sm:$0xff]   ;;  %v1440_v12 = vld [vmem:[%s1542_s2 + $0x10] sm:$0xff]   ;;  %p904_p7 = scmp.ne.s32.totalorder %s1227_s15, 3 }
  0x44   : > { %1034 = vmatpush3.bf16.msra.mxu0 %v1408_v1  ;;  %955 = vmatprep.subr.bf16.mxu1 %v1252_v3  ;;  %v1426_v10 = vld [vmem:[%s1542_s2] sm:$0xff]   ;;  %v1447_v13 = vld [vmem:[%s1542_s2 + $0x18] sm:$0xff]   ;;  %v895_v28 = vld [vmem:[%s1391_s30 + $0x8] sm:$0xff]  ;;  %vm796_vm4 = vcmask (!%p904_p7), 7168  }
  0x45   : > { %965 = vmatprep.mubr.msk.bf16.mxu1 %vm1251_vm1, %v1252_v3  ;;  %1035 = vmatprep.subr.bf16.mxu0 %v1250_v2  ;;  %v1454_v14 = vld [vmem:[%s1542_s2 + $0x20] sm:$0xff]   ;;  %v898_v46 = vld [vmem:[%s1391_s30 + $0x10] sm:$0xff] }
  0x46   : > { %956 = vmatpush3.bf16.msra.mxu1 %v1426_v10  ;;  %v901_v0 = vld [vmem:[%s1391_s30 + $0x18] sm:$0xff] }
  0x47   : > { %953 = vmatmul.mubr.msk.f32.vlgmr.msra.gmra.mrb[0].mxu0 %vm229_vm2, %v227_v4  ;;  %957 = vmatprep.subr.bf16.mxu1 %v1252_v3 }
  0x48   : > { %1037 = vmatpush3.bf16.msra.mxu0 %v1408_v1  ;;  %973 = vmatprep.mubr.msk.f32.mxu0 %vm1251_vm1, %v1252_v3 }
  0x49   : > { %976 = vmatprep.subr.bf16.mxu0 %v1252_v3 }
  0x4a   : > { %958 = vmatpush3.bf16.msra.mxu1 %v1433_v11 }
  0x4b   : > { %959 = vmatprep.subr.bf16.mxu1 %v1252_v3 }
  0x4e   : > { %960 = vmatpush3.bf16.msra.mxu1 %v1440_v12 }
  0x4f   : > { %961 = vmatprep.subr.bf16.mxu1 %v1252_v3 }
  0x52   : > { %962 = vmatpush3.bf16.msra.mxu1 %v1447_v13 }
  0x53   : > { %963 = vmatprep.subr.bf16.mxu1 %v1252_v3 }
  0x56   : > { %964 = vmatpush3.bf16.msra.mxu1 %v1454_v14 }
  0x57   : > { %1038 = vmatprep.subr.bf16.mxu1 %v1250_v2 }
 0x11a   : > { %v299_v6 = vpop.f32.mrb[0].mxu0 }
 0x11b   : > { %v303_v7 = vadd.f32 %v299_v6, %v228_v5  ;;  %v954_v8 = vpop.f32.mrb[1].mxu0 }
 0x11d   : > { %v305_v9 = vsel %vm304_vm3, %v303_v7, -inf }
 0x11e   : > { %306 = vmax.xlane.f32.xlu0 %v305_v9 }
 0x1ab   : > { %v307_v15 = vpop.xlane.xlu0 %306 }
 0x1ac   : > { %v308_v16 = vsub.f32 %v303_v7, %v307_v15 }
 0x1ae   : > { %v309_v17 = vmax.f32 %v308_v16, -80.0 }
 0x1b0   : > { %v310_v18 = vmul.f32 1.442695, %v309_v17 }
 0x1b2   : > { %1127 = vpow2.f32 %v310_v18 }
 0x1bc   : > { %v1128_v19 = vpop.eup %1127 }
 0x1bd   : > { %v312_v20 = vpack.c.bf16 %v1128_v19, %v1128_v19 }
 0x1bf   : > { %966 = vmatmul.mubr.msk.bf16.vlgmr.msra.gmra.mrb[0].mxu1 %vm304_vm3, %v312_v20 }
 0x1c0   : > { %1040 = vmatpush3.bf16.msra.mxu1 %v1408_v1  ;;  %994 = vmatprep.mubr.msk.f32.mxu1 %vm1251_vm1, %v1252_v3 }
 0x1c1   : > { %1041 = vmatprep.subr.bf16.mxu1 %v1250_v2 }
 0x292   : > { %v380_v21 = vpop.f32.mrb[0].mxu1 }
 0x293   : > { %1129 = vlog2.f32 %v380_v21  ;;  %v967_v22 = vpop.f32.mrb[1].mxu1 }
 0x294   : > { %v383_v23 = vpop.f32.mrb[2].mxu1 }
 0x295   : > { %v968_v24 = vpop.f32.mrb[3].mxu1 }
 0x29d   : > { %v1130_v25 = vpop.eup %1129 }
 0x29e   : > { %v387_v26 = vmul.f32 0.6931472, %v1130_v25 }
 0x2a0   : > { %v388_v27 = vadd.f32 %v387_v26, %v307_v15 }
 0x2a2   : > { %974 = vmatmul.mubr.msk.f32.vlgmr.msra.gmra.mrb[2].mxu0 %vm229_vm2, %v388_v27 }
 0x2a3   : > { %977 = vmatpush3.bf16.msra.mxu0 %v1426_v10  ;;  %986 = vmatprep.mubr.msk.bf16.mxu0 %vm1251_vm1, %v1252_v3 }
 0x2a4   : > { %978 = vmatprep.subr.bf16.mxu0 %v1252_v3 }
 0x2a7   : > { %979 = vmatpush3.bf16.msra.mxu0 %v1433_v11 }
 0x2a8   : > { %980 = vmatprep.subr.bf16.mxu0 %v1252_v3 }
 0x2ab   : > { %981 = vmatpush3.bf16.msra.mxu0 %v1440_v12 }
 0x2ac   : > { %982 = vmatprep.subr.bf16.mxu0 %v1252_v3 }
 0x2af   : > { %983 = vmatpush3.bf16.msra.mxu0 %v1447_v13 }
 0x2b0   : > { %984 = vmatprep.subr.bf16.mxu0 %v1252_v3 }
 0x2b3   : > { %985 = vmatpush3.bf16.msra.mxu0 %v1454_v14 }
 0x2b4   : > { %997 = vmatprep.subr.bf16.mxu0 %v1252_v3 }
 0x375   : > { %v460_v29 = vpop.f32.mrb[2].mxu0 }
 0x376   : > { %v464_v30 = vadd.f32 %v895_v28, %v460_v29  ;;  %v975_v31 = vpop.f32.mrb[3].mxu0 }
 0x378   : > { %v465_v32 = vsel %vm304_vm3, %v464_v30, -inf }
 0x379   : > { %466 = vmax.xlane.f32.xlu0 %v465_v32 }
 0x406   : > { %v467_v33 = vpop.xlane.xlu0 %466 }
 0x407   : > { %v468_v34 = vsub.f32 %v464_v30, %v467_v33 }
 0x409   : > { %v469_v35 = vmax.f32 %v468_v34, -80.0 }
 0x40b   : > { %v470_v36 = vmul.f32 1.442695, %v469_v35 }
 0x40d   : > { %1131 = vpow2.f32 %v470_v36 }
 0x417   : > { %v1132_v37 = vpop.eup %1131 }
 0x418   : > { %v472_v38 = vpack.c.bf16 %v1132_v37, %v1132_v37 }
 0x41a   : > { %987 = vmatmul.mubr.msk.bf16.vlgmr.msra.gmra.mrb[4].mxu0 %vm304_vm3, %v472_v38 }
 0x41b   : > { %998 = vmatpush3.bf16.msra.mxu0 %v1426_v10  ;;  %1007 = vmatprep.mubr.msk.bf16.mxu0 %vm1251_vm1, %v1252_v3 }
 0x41c   : > { %999 = vmatprep.subr.bf16.mxu0 %v1252_v3 }
 0x41f   : > { %1000 = vmatpush3.bf16.msra.mxu0 %v1433_v11 }
 0x420   : > { %1001 = vmatprep.subr.bf16.mxu0 %v1252_v3 }
 0x423   : > { %1002 = vmatpush3.bf16.msra.mxu0 %v1440_v12 }
 0x424   : > { %1003 = vmatprep.subr.bf16.mxu0 %v1252_v3 }
 0x427   : > { %1004 = vmatpush3.bf16.msra.mxu0 %v1447_v13 }
 0x428   : > { %1005 = vmatprep.subr.bf16.mxu0 %v1252_v3 }
 0x42b   : > { %1006 = vmatpush3.bf16.msra.mxu0 %v1454_v14 }
 0x4ed   : > { %v510_v39 = vpop.f32.mrb[4].mxu0 }
 0x4ee   : > { %1133 = vlog2.f32 %v510_v39  ;;  %v988_v40 = vpop.f32.mrb[5].mxu0 }
 0x4ef   : > { %v513_v41 = vpop.f32.mrb[6].mxu0 }
 0x4f0   : > { %v989_v42 = vpop.f32.mrb[7].mxu0 }
 0x4f8   : > { %v1134_v43 = vpop.eup %1133 }
 0x4f9   : > { %v517_v44 = vmul.f32 0.6931472, %v1134_v43 }
 0x4fb   : > { %v518_v45 = vadd.f32 %v517_v44, %v467_v33 }
 0x4fd   : > { %995 = vmatmul.mubr.msk.f32.vlgmr.msra.gmra.mrb[4].mxu1 %vm229_vm2, %v518_v45 }
 0x4fe   : > { %1043 = vmatpush3.bf16.msra.mxu1 %v1408_v1  ;;  %1015 = vmatprep.mubr.msk.f32.mxu1 %vm1251_vm1, %v1252_v3 }
 0x4ff   : > { %1018 = vmatprep.subr.bf16.mxu1 %v1252_v3 }
 0x5d0   : > { %v590_v47 = vpop.f32.mrb[4].mxu1 }
 0x5d1   : > { %v594_v48 = vadd.f32 %v898_v46, %v590_v47  ;;  %v996_v49 = vpop.f32.mrb[5].mxu1 }
 0x5d3   : > { %v595_v50 = vsel %vm304_vm3, %v594_v48, -inf }
 0x5d4   : > { %596 = vmax.xlane.f32.xlu1 %v595_v50 }
 0x661   : > { %v597_v51 = vpop.xlane.xlu1 %596 }
 0x662   : > { %v598_v52 = vsub.f32 %v594_v48, %v597_v51 }
 0x664   : > { %v599_v53 = vmax.f32 %v598_v52, -80.0 }
 0x666   : > { %v600_v54 = vmul.f32 1.442695, %v599_v53 }
 0x668   : > { %1135 = vpow2.f32 %v600_v54 }
 0x672   : > { %v1136_v55 = vpop.eup %1135 }
 0x673   : > { %v602_v56 = vpack.c.bf16 %v1136_v55, %v1136_v55 }
 0x675   : > { %1008 = vmatmul.mubr.msk.bf16.vlgmr.msra.gmra.mrb[8].mxu0 %vm304_vm3, %v602_v56 }
 0x748   : > { %v640_v57 = vpop.f32.mrb[8].mxu0 }
 0x749   : > { %1137 = vlog2.f32 %v640_v57  ;;  %v1009_v58 = vpop.f32.mrb[9].mxu0 }
 0x74a   : > { %v643_v59 = vpop.f32.mrb[10].mxu0 }
 0x74b   : > { %v1010_v60 = vpop.f32.mrb[11].mxu0 }
 0x753   : > { %v1138_v61 = vpop.eup %1137 }
 0x754   : > { %v647_v62 = vmul.f32 0.6931472, %v1138_v61 }
 0x756   : > { %v648_v63 = vadd.f32 %v647_v62, %v597_v51 }
 0x758   : > { %1016 = vmatmul.mubr.msk.f32.vlgmr.msra.gmra.mrb[6].mxu1 %vm229_vm2, %v648_v63 }
 0x759   : > { %1019 = vmatpush3.bf16.msra.mxu1 %v1426_v10  ;;  %1028 = vmatprep.mubr.msk.bf16.mxu1 %vm1251_vm1, %v1252_v3 }
 0x75a   : > { %1020 = vmatprep.subr.bf16.mxu1 %v1252_v3 }
 0x75d   : > { %1021 = vmatpush3.bf16.msra.mxu1 %v1433_v11 }
 0x75e   : > { %1022 = vmatprep.subr.bf16.mxu1 %v1252_v3 }
 0x761   : > { %1023 = vmatpush3.bf16.msra.mxu1 %v1440_v12 }
 0x762   : > { %1024 = vmatprep.subr.bf16.mxu1 %v1252_v3 }
 0x765   : > { %1025 = vmatpush3.bf16.msra.mxu1 %v1447_v13 }
 0x766   : > { %1026 = vmatprep.subr.bf16.mxu1 %v1252_v3 }
 0x769   : > { %1027 = vmatpush3.bf16.msra.mxu1 %v1454_v14 }
 0x82b   : > { %v720_v1 = vpop.f32.mrb[6].mxu1 }
 0x82c   : > { %v724_v2 = vadd.f32 %v901_v0, %v720_v1  ;;  %v1017_v4 = vpop.f32.mrb[7].mxu1 }
 0x82e   : > { %v725_v5 = vsel %vm304_vm3, %v724_v2, -inf }
 0x82f   : > { %726 = vmax.xlane.f32.xlu1 %v725_v5 }
 0x8bc   : > { %v727_v6 = vpop.xlane.xlu1 %726 }
 0x8bd   : > { %v728_v7 = vsub.f32 %v724_v2, %v727_v6 }
 0x8bf   : > { %v729_v8 = vmax.f32 %v728_v7, -80.0 }
 0x8c1   : > { %v730_v9 = vmul.f32 1.442695, %v729_v8 }
 0x8c3   : > { %1139 = vpow2.f32 %v730_v9 }
 0x8cd   : > { %v1140_v10 = vpop.eup %1139 }
 0x8ce   : > { %v732_v11 = vpack.c.bf16 %v1140_v10, %v1140_v10 }
 0x8d0   : > { %1029 = vmatmul.mubr.msk.bf16.vlgmr.msra.gmra.mrb[8].mxu1 %vm304_vm3, %v732_v11 }
 0x9a3   : > { %v770_v12 = vpop.f32.mrb[8].mxu1 }
 0x9a4   : > { %1141 = vlog2.f32 %v770_v12  ;;  %v1030_v3 = vpop.f32.mrb[9].mxu1 }
 0x9a5   : > { %v773_v13 = vpop.f32.mrb[10].mxu1 }
 0x9a6   : > { %v1031_v14 = vpop.f32.mrb[11].mxu1 }
 0x9ad   : > { %783 = sbr.rel (%p904_p7) target bundleno = 2800 (0xaf0), region = 44 }
 0x9ae   : > { %v1142_v15 = vpop.eup %1141 }
 0x9af   : > { %v777_v16 = vmul.f32 0.6931472, %v1142_v15 }
 0x9b1   : > { %v778_v17 = vadd.f32 %v777_v16, %v727_v6 }
 0x9b3   : > { %779 = vst.msk [vmem:[#allocation2] sm:$0xff] %vm229_vm2, %v778_v17  ;;  %v784_v18 = vsel (!%p904_p7), %vm229_vm2, %v778_v17, -inf }
 0x9b4   : > { %785 = vmax.xlane.f32.xlu0 %v784_v18 }
 0xa41   : > { %v786_v19 = vpop.xlane.xlu0 %785 }
 0xa42   : > { %v787_v20 = vsub.f32 %v778_v17, %v786_v19 }
 0xa44   : > { %v788_v21 = vmul.f32 1.442695, %v787_v20 }
 0xa46   : > { %1143 = vpow2.f32 %v788_v21 }
 0xa50   : > { %v1144_v22 = vpop.eup %1143 }
 0xa51   : > { %v790_v23 = vsel %vm229_vm2, %v1144_v22, 0.0 }
 0xa52   : > { %791 = vadd.xlane.f32.xlu0 %v790_v23 }
 0xadf   : > { %v792_v24 = vpop.xlane.xlu0 %791 }
 0xae0   : > { %1145 = vlog2.f32 %v792_v24 }
 0xaea   : > { %v1146_v25 = vpop.eup %1145 }
 0xaeb   : > { %v794_v26 = vmul.f32 0.6931472, %v1146_v25 }
 0xaed   : > { %v795_v27 = vadd.f32 %v794_v26, %v786_v19 }
 0xaef   : > { %797 = vst.msk [vmem:[%s1402_s23] sm:$0xff] %vm796_vm4, %v795_v27 }
 0xaf0 PF: > { %s16_s19 = sadd.s32 1, %s1243_s19   ;;  %s1548_s12 = smov %s1219_s13 }
 0xaf1   : > { %p13_p6 = scmp.ge.s32.totalorder %s16_s19, 10   ;;  %s1549_s13 = smov %s1223_s14 }
 0xaf2   : > { %s1550_s14 = smov %s1340_s5  ;;  %s1551_s15 = smov %s1235_s17 }
 0xaf3   : > { %s1552_s16 = smov %s1239_s18  ;;  %s1553_s17 = smov %s1556_s21 }
 0xaf4   : > { %s1554_s18 = smov %s1560_s22  ;;  %15 = sbr.rel (!%p13_p6) target bundleno = 5 (0x5), region = 83 }
 0xafb   :  { %817 = vsyncpa [#allocation4], 1 }
 0xafc   :  { %819 = vsyncpa [#allocation4 + $0x1], 1 }

</bundles_post_ra>
